<compile_context>
chip_gen: v7x
topology: tpu7x:2x2x1
jax: 0.10.0
libtpu: 0.0.40
codegen_flags: <defaults>
</compile_context>

<pallas_src>
import jax
import jax.numpy as jnp
from jax.experimental import pallas as pl
from jax.experimental.pallas import tpu as pltpu


def _round_up(x, m):
    return (x + m - 1) // m * m


def _device_tuning(H):
    """Pick (num_col_splits, tk) from the local TPU generation.

    - v7x: use both TensorCores via a column split of the lin1 output (and the
      matching W2 rows), and nk=2 grid steps (per-step overhead is a large
      fraction of the ~1.4us weight stream at 3.2 TB/s).
    - v5e / v6e: single core, tk=512 keeps the W1 stream double-buffered with
      negligible per-step overhead at their lower HBM bandwidth.
    """
    kind = ""
    try:
        kind = jax.devices()[0].device_kind.lower()
    except Exception:
        pass
    is_v7 = "v7" in kind
    nc = 2 if (is_v7 and H % 256 == 0) else 1
    if is_v7 or H % 512 != 0:
        tk = H
    else:
        tk = 512
    return nc, tk


def _make_re_head_kernel(B, Bp, H, Hc, tk, nk):
    """Build the fused RE-head kernel for static shapes.

    Grid: (nc, nk).  Axis 0 ("parallel"): lin1-output column split (v7x dual
    TC).  Axis 1 ("arbitrary"): the 2H lin1 contraction split into nk chunks
    of tk rows; chunks [0, cpr) consume the "sub" half, [cpr, nk) the "obj"
    half of the gathered activation slab.
    """
    cpr = H // tk  # K-chunks per gathered half (sub / obj)

    def kernel(sub_row_ref, obj_row_ref,   # SMEM prefetch: absolute enc rows, [B] int32
               enc_ref,                    # [B*S, H] backbone output, HBM (pl.ANY)
               w1_ref,                     # [tk, Hc] bf16  W1 K-chunk (column split)
               b1_ref,                     # [1, Hc]  f32   lin1 bias slice
               w2_ref,                     # [Hc, Lp] bf16  lin2 weight row slice (lane padded)
               o_ref,                      # [Bp, Lp] f32   per-core partial logits
               x_ref,                      # VMEM [2*Bp, H] gathered [sub | obj] rows
               acc_ref,                    # VMEM [Bp, Hc] f32 lin1 accumulator (b1-init'ed)
               sems):                      # DMA sems, one per gather row: (2, B)
        k = pl.program_id(1)

        def gather_wait(half):
            # Wait-only descriptors: shapes must match the original copies.
            for b in range(B):
                pltpu.make_async_copy(
                    enc_ref.at[pl.ds(0, 1), :],
                    x_ref.at[pl.ds(half * Bp + b, 1), :],
                    sems.at[half, b]).wait()

        @pl.when(k == 0)
        def _init():
            # Fused gather + concat: one whole-row DMA per (half, batch) from
            # the encoder output in HBM.  Issue everything up front; the init
            # work below overlaps with the copies in flight.
            for half, rows_ref in ((0, sub_row_ref), (1, obj_row_ref)):
                for b in range(B):
                    pltpu.make_async_copy(
                        enc_ref.at[pl.ds(rows_ref[b], 1), :],
                        x_ref.at[pl.ds(half * Bp + b, 1), :],
                        sems.at[half, b]).start()
            # Fold b1 into the accumulator (drops the finalize bias add).
            acc_ref[...] = jnp.broadcast_to(b1_ref[...], acc_ref.shape)
            # Zero the batch-padding rows (disjoint from the DMA destinations;
            # they only feed output rows sliced off in the wrapper).
            if Bp > B:
                for half in range(2):
                    x_ref[pl.ds(half * Bp + B, Bp - B), :] = jnp.zeros(
                        (Bp - B, H), x_ref.dtype)
            # Only the sub half is needed before the first matmul step.
            gather_wait(0)

        @pl.when(k == cpr)
        def _wait_obj():
            # Obj rows are first consumed at k == cpr; their gather has been
            # hiding behind the sub-half matmul / W1 streaming until now.
            gather_wait(1)

        # lin1 K-chunk: [Bp, tk] @ [tk, Hc] on the MXU, f32 accumulation.
        if cpr == 1:
            row = pl.multiple_of(k * Bp, Bp)
            xk = x_ref[pl.ds(row, Bp), :]
        else:
            row = pl.multiple_of((k // cpr) * Bp, Bp)
            col = pl.multiple_of((k % cpr) * tk, tk)
            xk = x_ref[pl.ds(row, Bp), pl.ds(col, tk)]
        acc_ref[...] += jnp.dot(xk.astype(jnp.bfloat16), w1_ref[...],
                                preferred_element_type=jnp.float32)

        @pl.when(k == nk - 1)
        def _finalize():
            # ReLU (b1 already folded in); Dropout(p=0.1) is identity in eval.
            h = jnp.maximum(acc_ref[...], 0.0)
            # Per-core partial of lin2 on the lane-padded output; b2 and the
            # cross-core sum are applied in the wrapper.
            o_ref[...] = jnp.dot(h.astype(jnp.bfloat16), w2_ref[...],
                                 preferred_element_type=jnp.float32)

    return kernel


def re_model_forward(encoder_out, start_obj_idx, start_sub_idx,
                     w1, b1, w2, b2, *, tk=None, num_col_splits=None):
    """Replicates REmodel.forward given the backbone output `encoder_out`.

    encoder_out   : [B, S, H] float  (stand-in for AutoModel(...)[0])
    start_obj_idx : [B] int32
    start_sub_idx : [B] int32
    w1 : [2H, H], b1 : [H], w2 : [H, L], b2 : [L]
    returns       : {'logits': [B, L] float32}
    """
    B, S, H = encoder_out.shape
    F = w1.shape[0]
    L = w2.shape[1]
    assert F == 2 * H and w1.shape[1] == H and w2.shape[0] == H
    assert H % 128 == 0, H

    auto_nc, auto_tk = _device_tuning(H)
    if num_col_splits is None:
        num_col_splits = auto_nc
    if tk is None:
        tk = auto_tk
    nc = num_col_splits
    assert H % nc == 0 and (H // nc) % 128 == 0, (H, nc)
    assert H % tk == 0 and tk % 128 == 0, (H, tk)
    Hc = H // nc                       # lin1 output columns per core
    nk = F // tk                       # grid steps along the lin1 contraction
    Bp = _round_up(max(B, 8), 8)       # sublane-aligned batch
    Lp = _round_up(L, 128)             # lane-dense output (unmasked stores)

    # bf16 weight streaming (kernel accumulates in f32).  One-time param prep.
    w1_bf = w1.astype(jnp.bfloat16)
    w2_bf = jnp.zeros((H, Lp), jnp.bfloat16).at[:, :L].set(
        w2.astype(jnp.bfloat16))
    b1_2d = b1.reshape(1, H).astype(jnp.float32)
    b2_2d = jnp.zeros((1, Lp), jnp.float32).at[:, :L].set(
        b2.reshape(1, L).astype(jnp.float32))

    # Absolute gather rows: outputs[b, idx+1, :]  ->  row b*S + idx + 1 of the
    # flattened [B*S, H] encoder output.  idx+1 is clamped to S-1 so an
    # edge-case start index cannot trip an out-of-bounds DMA.
    bi = jnp.arange(B, dtype=jnp.int32)
    sub_rows = bi * S + jnp.minimum(start_sub_idx.astype(jnp.int32) + 1, S - 1)
    obj_rows = bi * S + jnp.minimum(start_obj_idx.astype(jnp.int32) + 1, S - 1)

    enc_flat = encoder_out.reshape(B * S, H)
    kernel = _make_re_head_kernel(B, Bp, H, Hc, tk, nk)

    grid_spec = pltpu.PrefetchScalarGridSpec(
        num_scalar_prefetch=2,     # sub_rows, obj_rows -> SMEM
        grid=(nc, nk),
        in_specs=[
            pl.BlockSpec(memory_space=pl.ANY),                  # encoder out stays in HBM
            pl.BlockSpec((tk, Hc), lambda j, k, s, o: (k, j)),  # W1 K-chunk / col split
            pl.BlockSpec((1, Hc), lambda j, k, s, o: (0, j)),   # b1 column slice
            pl.BlockSpec((Hc, Lp), lambda j, k, s, o: (j, 0)),  # W2 row slice (padded lanes)
        ],
        out_specs=pl.BlockSpec((Bp, Lp), lambda j, k, s, o: (j, 0)),
        scratch_shapes=[
            pltpu.VMEM((2 * Bp, H), encoder_out.dtype),   # gathered [sub | obj] rows
            pltpu.VMEM((Bp, Hc), jnp.float32),            # lin1 f32 accumulator
            pltpu.SemaphoreType.DMA((2, B)),              # one sem per gather row
        ],
    )

    # Advisory cost hint so XLA can schedule surrounding ops sensibly.
    cost = pl.CostEstimate(
        flops=2 * B * (2 * H) * H + 2 * B * H * Lp,
        transcendentals=0,
        bytes_accessed=(w1_bf.size * 2 + w2_bf.size * 2 + b1_2d.size * 4
                        + nc * 2 * B * H * encoder_out.dtype.itemsize
                        + nc * Bp * Lp * 4),
    )

    partials = pl.pallas_call(
        kernel,
        grid_spec=grid_spec,
        out_shape=jax.ShapeDtypeStruct((nc * Bp, Lp), jnp.float32),
        cost_estimate=cost,
        compiler_params=pltpu.CompilerParams(
            # Leading axis: per-core lin1-output column split ("parallel" so the
            # two v7x TensorCores each stream their own W1/W2 halves; the gather
            # init runs per core and is never split across this axis).
            # Inner axis: the lin1 reduction -> "arbitrary".
            dimension_semantics=("parallel", "arbitrary")),
    )(sub_rows, obj_rows, enc_flat, w1_bf, b1_2d, w2_bf)

    logits = (jnp.sum(partials.reshape(nc, Bp, Lp), axis=0) + b2_2d)[:B, :L]
    return {"logits": logits}


def _reference(encoder_out, start_obj_idx, start_sub_idx, w1, b1, w2, b2):
    """Pure-JAX reference using the same bf16-quantized weights, f32 math."""
    B, S, _ = encoder_out.shape
    bi = jnp.arange(B)
    sub = encoder_out[bi, jnp.minimum(start_sub_idx + 1, S - 1), :]
    obj = encoder_out[bi, jnp.minimum(start_obj_idx + 1, S - 1), :]
    x = jnp.concatenate([sub, obj], axis=-1).astype(jnp.float32)
    w1b = w1.astype(jnp.bfloat16).astype(jnp.float32)
    w2b = w2.astype(jnp.bfloat16).astype(jnp.float32)
    hi = jax.lax.Precision.HIGHEST
    h = jnp.maximum(jnp.dot(x, w1b, precision=hi) + b1, 0.0)
    return jnp.dot(h, w2b, precision=hi) + b2


if __name__ == "__main__":
    # Small shapes (original module uses hidden_size=1024, num_labels=30).
    B, S, H, L = 4, 8, 128, 30

    key = jax.random.PRNGKey(0)
    k_enc, k_w1, k_b1, k_w2, k_b2, k_sub, k_obj = jax.random.split(key, 7)

    # TODO(synk): AutoModel.from_pretrained(...) backbone is not translatable;
    # its [B, S, H] hidden-state output is provided as a synthetic input here.
    encoder_out = jax.random.normal(k_enc, (B, S, H), dtype=jnp.float32)

    # Head parameters (lin1: 2H->H, lin2: H->L), stored [in, out].
    w1 = jax.random.normal(k_w1, (2 * H, H), jnp.float32) / jnp.sqrt(2.0 * H)
    b1 = jax.random.normal(k_b1, (H,), jnp.float32) * 0.01
    w2 = jax.random.normal(k_w2, (H, L), jnp.float32) / jnp.sqrt(1.0 * H)
    b2 = jax.random.normal(k_b2, (L,), jnp.float32) * 0.01

    # Token start indices (idx + 1 stays in-bounds of S).
    start_sub_idx = jax.random.randint(k_sub, (B,), 0, S - 1, dtype=jnp.int32)
    start_obj_idx = jax.random.randint(k_obj, (B,), 0, S - 1, dtype=jnp.int32)

    out = re_model_forward(encoder_out, start_obj_idx, start_sub_idx,
                           w1, b1, w2, b2)
    logits = jax.block_until_ready(out["logits"])
    assert logits.shape == (B, L), logits.shape

    ref = _reference(encoder_out, start_obj_idx, start_sub_idx,
                     w1, b1, w2, b2)
    max_err = float(jnp.max(jnp.abs(logits - ref)))
    # bf16 activation/weight streaming -> loosened tolerance vs f32 reference.
    assert jnp.allclose(logits, ref, atol=2e-2, rtol=2e-2), (
        "mismatch vs reference", max_err)

    print("KERNEL_OK")
</pallas_src>

<mosaic_0001>
module attributes {stable_mosaic.version = 11 : i64} {
  func.func @kernel(%arg0: i32, %arg1: i32, %arg2: memref<4xi32, #tpu.memory_space<smem>>, %arg3: memref<4xi32, #tpu.memory_space<smem>>, %arg4: memref<32x128xf32, #tpu.memory_space<any>>, %arg5: memref<128x128xbf16, #tpu.memory_space<vmem>>, %arg6: memref<1x128xf32, #tpu.memory_space<vmem>>, %arg7: memref<128x128xbf16, #tpu.memory_space<vmem>>, %arg8: memref<8x128xf32, #tpu.memory_space<vmem>>, %arg9: memref<16x128xf32, #tpu.memory_space<vmem>>, %arg10: memref<8x128xf32, #tpu.memory_space<vmem>>, %arg11: memref<2x4x!tpu.dma_semaphore, #tpu.memory_space<semaphore_mem>>) attributes {dimension_semantics = [#tpu.dimension_semantics<parallel>, #tpu.dimension_semantics<arbitrary>], iteration_bounds = array<i64: 1, 2>, scalar_prefetch = 2 : i64, scratch_operands = 3 : i64, tpu.core_type = #tpu.core_type<tc>, window_params = [{}, {transform_indices = @transform_1, window_bounds = array<i64: 128, 128>}, {transform_indices = @transform_2, window_bounds = array<i64: 1, 128>}, {transform_indices = @transform_3, window_bounds = array<i64: 128, 128>}, {transform_indices = @transform_4, window_bounds = array<i64: 8, 128>}]} {
    %c0_i32 = arith.constant 0 : i32
    %0 = arith.cmpi eq, %arg1, %c0_i32 : i32
    %1 = arith.extui %0 : i1 to i32
    %c0_i32_0 = arith.constant 0 : i32
    %2 = arith.cmpi ne, %1, %c0_i32_0 : i32
    scf.if %2 {
      %c0_10 = arith.constant 0 : index
      %19 = memref.load %arg2[%c0_10] : memref<4xi32, #tpu.memory_space<smem>>
      %c0_i32_11 = arith.constant 0 : i32
      %c0_i32_12 = arith.constant 0 : i32
      %c0_i32_13 = arith.constant 0 : i32
      %20 = tpu.memref_slice %arg4[%19, %c0_i32_13] : memref<32x128xf32, #tpu.memory_space<any>> -> memref<1x128xf32, #tpu.memory_space<any>>
      %c0_i32_14 = arith.constant 0 : i32
      %c0_i32_15 = arith.constant 0 : i32
      %21 = tpu.memref_slice %arg9[%c0_i32_14, %c0_i32_15] : memref<16x128xf32, #tpu.memory_space<vmem>> -> memref<1x128xf32, #tpu.memory_space<vmem>>
      %22 = tpu.memref_slice %arg11[%c0_i32_11, %c0_i32_12] : memref<2x4x!tpu.dma_semaphore, #tpu.memory_space<semaphore_mem>> -> memref<1x1x!tpu.dma_semaphore, #tpu.memory_space<semaphore_mem>>
      %23 = tpu.memref_squeeze %22 : memref<1x1x!tpu.dma_semaphore, #tpu.memory_space<semaphore_mem>> -> memref<!tpu.dma_semaphore, #tpu.memory_space<semaphore_mem>>
      tpu.enqueue_dma source(%20 : memref<1x128xf32, #tpu.memory_space<any>>) target(%21 : memref<1x128xf32, #tpu.memory_space<vmem>>) target_semaphore(%23 : memref<!tpu.dma_semaphore, #tpu.memory_space<semaphore_mem>>)
      %c1 = arith.constant 1 : index
      %24 = memref.load %arg2[%c1] : memref<4xi32, #tpu.memory_space<smem>>
      %c0_i32_16 = arith.constant 0 : i32
      %c1_i32_17 = arith.constant 1 : i32
      %c0_i32_18 = arith.constant 0 : i32
      %25 = tpu.memref_slice %arg4[%24, %c0_i32_18] : memref<32x128xf32, #tpu.memory_space<any>> -> memref<1x128xf32, #tpu.memory_space<any>>
      %c1_i32_19 = arith.constant 1 : i32
      %c0_i32_20 = arith.constant 0 : i32
      %26 = tpu.memref_slice %arg9[%c1_i32_19, %c0_i32_20] : memref<16x128xf32, #tpu.memory_space<vmem>> -> memref<1x128xf32, #tpu.memory_space<vmem>>
      %27 = tpu.memref_slice %arg11[%c0_i32_16, %c1_i32_17] : memref<2x4x!tpu.dma_semaphore, #tpu.memory_space<semaphore_mem>> -> memref<1x1x!tpu.dma_semaphore, #tpu.memory_space<semaphore_mem>>
      %28 = tpu.memref_squeeze %27 : memref<1x1x!tpu.dma_semaphore, #tpu.memory_space<semaphore_mem>> -> memref<!tpu.dma_semaphore, #tpu.memory_space<semaphore_mem>>
      tpu.enqueue_dma source(%25 : memref<1x128xf32, #tpu.memory_space<any>>) target(%26 : memref<1x128xf32, #tpu.memory_space<vmem>>) target_semaphore(%28 : memref<!tpu.dma_semaphore, #tpu.memory_space<semaphore_mem>>)
      %c2 = arith.constant 2 : index
      %29 = memref.load %arg2[%c2] : memref<4xi32, #tpu.memory_space<smem>>
      %c0_i32_21 = arith.constant 0 : i32
      %c2_i32 = arith.constant 2 : i32
      %c0_i32_22 = arith.constant 0 : i32
      %30 = tpu.memref_slice %arg4[%29, %c0_i32_22] : memref<32x128xf32, #tpu.memory_space<any>> -> memref<1x128xf32, #tpu.memory_space<any>>
      %c2_i32_23 = arith.constant 2 : i32
      %c0_i32_24 = arith.constant 0 : i32
      %31 = tpu.memref_slice %arg9[%c2_i32_23, %c0_i32_24] : memref<16x128xf32, #tpu.memory_space<vmem>> -> memref<1x128xf32, #tpu.memory_space<vmem>>
      %32 = tpu.memref_slice %arg11[%c0_i32_21, %c2_i32] : memref<2x4x!tpu.dma_semaphore, #tpu.memory_space<semaphore_mem>> -> memref<1x1x!tpu.dma_semaphore, #tpu.memory_space<semaphore_mem>>
      %33 = tpu.memref_squeeze %32 : memref<1x1x!tpu.dma_semaphore, #tpu.memory_space<semaphore_mem>> -> memref<!tpu.dma_semaphore, #tpu.memory_space<semaphore_mem>>
      tpu.enqueue_dma source(%30 : memref<1x128xf32, #tpu.memory_space<any>>) target(%31 : memref<1x128xf32, #tpu.memory_space<vmem>>) target_semaphore(%33 : memref<!tpu.dma_semaphore, #tpu.memory_space<semaphore_mem>>)
      %c3 = arith.constant 3 : index
      %34 = memref.load %arg2[%c3] : memref<4xi32, #tpu.memory_space<smem>>
      %c0_i32_25 = arith.constant 0 : i32
      %c3_i32 = arith.constant 3 : i32
      %c0_i32_26 = arith.constant 0 : i32
      %35 = tpu.memref_slice %arg4[%34, %c0_i32_26] : memref<32x128xf32, #tpu.memory_space<any>> -> memref<1x128xf32, #tpu.memory_space<any>>
      %c3_i32_27 = arith.constant 3 : i32
      %c0_i32_28 = arith.constant 0 : i32
      %36 = tpu.memref_slice %arg9[%c3_i32_27, %c0_i32_28] : memref<16x128xf32, #tpu.memory_space<vmem>> -> memref<1x128xf32, #tpu.memory_space<vmem>>
      %37 = tpu.memref_slice %arg11[%c0_i32_25, %c3_i32] : memref<2x4x!tpu.dma_semaphore, #tpu.memory_space<semaphore_mem>> -> memref<1x1x!tpu.dma_semaphore, #tpu.memory_space<semaphore_mem>>
      %38 = tpu.memref_squeeze %37 : memref<1x1x!tpu.dma_semaphore, #tpu.memory_space<semaphore_mem>> -> memref<!tpu.dma_semaphore, #tpu.memory_space<semaphore_mem>>
      tpu.enqueue_dma source(%35 : memref<1x128xf32, #tpu.memory_space<any>>) target(%36 : memref<1x128xf32, #tpu.memory_space<vmem>>) target_semaphore(%38 : memref<!tpu.dma_semaphore, #tpu.memory_space<semaphore_mem>>)
      %c0_29 = arith.constant 0 : index
      %39 = memref.load %arg3[%c0_29] : memref<4xi32, #tpu.memory_space<smem>>
      %c1_i32_30 = arith.constant 1 : i32
      %c0_i32_31 = arith.constant 0 : i32
      %c0_i32_32 = arith.constant 0 : i32
      %40 = tpu.memref_slice %arg4[%39, %c0_i32_32] : memref<32x128xf32, #tpu.memory_space<any>> -> memref<1x128xf32, #tpu.memory_space<any>>
      %c8_i32_33 = arith.constant 8 : i32
      %c0_i32_34 = arith.constant 0 : i32
      %41 = tpu.memref_slice %arg9[%c8_i32_33, %c0_i32_34] : memref<16x128xf32, #tpu.memory_space<vmem>> -> memref<1x128xf32, #tpu.memory_space<vmem>>
      %42 = tpu.memref_slice %arg11[%c1_i32_30, %c0_i32_31] : memref<2x4x!tpu.dma_semaphore, #tpu.memory_space<semaphore_mem>> -> memref<1x1x!tpu.dma_semaphore, #tpu.memory_space<semaphore_mem>>
      %43 = tpu.memref_squeeze %42 : memref<1x1x!tpu.dma_semaphore, #tpu.memory_space<semaphore_mem>> -> memref<!tpu.dma_semaphore, #tpu.memory_space<semaphore_mem>>
      tpu.enqueue_dma source(%40 : memref<1x128xf32, #tpu.memory_space<any>>) target(%41 : memref<1x128xf32, #tpu.memory_space<vmem>>) target_semaphore(%43 : memref<!tpu.dma_semaphore, #tpu.memory_space<semaphore_mem>>)
      %c1_35 = arith.constant 1 : index
      %44 = memref.load %arg3[%c1_35] : memref<4xi32, #tpu.memory_space<smem>>
      %c1_i32_36 = arith.constant 1 : i32
      %c1_i32_37 = arith.constant 1 : i32
      %c0_i32_38 = arith.constant 0 : i32
      %45 = tpu.memref_slice %arg4[%44, %c0_i32_38] : memref<32x128xf32, #tpu.memory_space<any>> -> memref<1x128xf32, #tpu.memory_space<any>>
      %c9_i32 = arith.constant 9 : i32
      %c0_i32_39 = arith.constant 0 : i32
      %46 = tpu.memref_slice %arg9[%c9_i32, %c0_i32_39] : memref<16x128xf32, #tpu.memory_space<vmem>> -> memref<1x128xf32, #tpu.memory_space<vmem>>
      %47 = tpu.memref_slice %arg11[%c1_i32_36, %c1_i32_37] : memref<2x4x!tpu.dma_semaphore, #tpu.memory_space<semaphore_mem>> -> memref<1x1x!tpu.dma_semaphore, #tpu.memory_space<semaphore_mem>>
      %48 = tpu.memref_squeeze %47 : memref<1x1x!tpu.dma_semaphore, #tpu.memory_space<semaphore_mem>> -> memref<!tpu.dma_semaphore, #tpu.memory_space<semaphore_mem>>
      tpu.enqueue_dma source(%45 : memref<1x128xf32, #tpu.memory_space<any>>) target(%46 : memref<1x128xf32, #tpu.memory_space<vmem>>) target_semaphore(%48 : memref<!tpu.dma_semaphore, #tpu.memory_space<semaphore_mem>>)
      %c2_40 = arith.constant 2 : index
      %49 = memref.load %arg3[%c2_40] : memref<4xi32, #tpu.memory_space<smem>>
      %c1_i32_41 = arith.constant 1 : i32
      %c2_i32_42 = arith.constant 2 : i32
      %c0_i32_43 = arith.constant 0 : i32
      %50 = tpu.memref_slice %arg4[%49, %c0_i32_43] : memref<32x128xf32, #tpu.memory_space<any>> -> memref<1x128xf32, #tpu.memory_space<any>>
      %c10_i32 = arith.constant 10 : i32
      %c0_i32_44 = arith.constant 0 : i32
      %51 = tpu.memref_slice %arg9[%c10_i32, %c0_i32_44] : memref<16x128xf32, #tpu.memory_space<vmem>> -> memref<1x128xf32, #tpu.memory_space<vmem>>
      %52 = tpu.memref_slice %arg11[%c1_i32_41, %c2_i32_42] : memref<2x4x!tpu.dma_semaphore, #tpu.memory_space<semaphore_mem>> -> memref<1x1x!tpu.dma_semaphore, #tpu.memory_space<semaphore_mem>>
      %53 = tpu.memref_squeeze %52 : memref<1x1x!tpu.dma_semaphore, #tpu.memory_space<semaphore_mem>> -> memref<!tpu.dma_semaphore, #tpu.memory_space<semaphore_mem>>
      tpu.enqueue_dma source(%50 : memref<1x128xf32, #tpu.memory_space<any>>) target(%51 : memref<1x128xf32, #tpu.memory_space<vmem>>) target_semaphore(%53 : memref<!tpu.dma_semaphore, #tpu.memory_space<semaphore_mem>>)
      %c3_45 = arith.constant 3 : index
      %54 = memref.load %arg3[%c3_45] : memref<4xi32, #tpu.memory_space<smem>>
      %c1_i32_46 = arith.constant 1 : i32
      %c3_i32_47 = arith.constant 3 : i32
      %c0_i32_48 = arith.constant 0 : i32
      %55 = tpu.memref_slice %arg4[%54, %c0_i32_48] : memref<32x128xf32, #tpu.memory_space<any>> -> memref<1x128xf32, #tpu.memory_space<any>>
      %c11_i32 = arith.constant 11 : i32
      %c0_i32_49 = arith.constant 0 : i32
      %56 = tpu.memref_slice %arg9[%c11_i32, %c0_i32_49] : memref<16x128xf32, #tpu.memory_space<vmem>> -> memref<1x128xf32, #tpu.memory_space<vmem>>
      %57 = tpu.memref_slice %arg11[%c1_i32_46, %c3_i32_47] : memref<2x4x!tpu.dma_semaphore, #tpu.memory_space<semaphore_mem>> -> memref<1x1x!tpu.dma_semaphore, #tpu.memory_space<semaphore_mem>>
      %58 = tpu.memref_squeeze %57 : memref<1x1x!tpu.dma_semaphore, #tpu.memory_space<semaphore_mem>> -> memref<!tpu.dma_semaphore, #tpu.memory_space<semaphore_mem>>
      tpu.enqueue_dma source(%55 : memref<1x128xf32, #tpu.memory_space<any>>) target(%56 : memref<1x128xf32, #tpu.memory_space<vmem>>) target_semaphore(%58 : memref<!tpu.dma_semaphore, #tpu.memory_space<semaphore_mem>>)
      %c0_50 = arith.constant 0 : index
      %c0_51 = arith.constant 0 : index
      %59 = vector.load %arg6[%c0_50, %c0_51] : memref<1x128xf32, #tpu.memory_space<vmem>>, vector<1x128xf32>
      %60 = vector.shape_cast %59 : vector<1x128xf32> to vector<1x128xf32>
      %61 = vector.broadcast %60 : vector<1x128xf32> to vector<8x128xf32>
      %c0_52 = arith.constant 0 : index
      %c0_53 = arith.constant 0 : index
      %62 = vector.load %arg10[%c0_52, %c0_53] : memref<8x128xf32, #tpu.memory_space<vmem>>, vector<8x128xf32>
      tpu.vector_store %arg10[%c0_52, %c0_53], %61 {strides = array<i32>} : memref<8x128xf32, #tpu.memory_space<vmem>>, vector<8x128xf32>,
      %cst_54 = arith.constant 0.000000e+00 : f32
      %63 = vector.broadcast %cst_54 : f32 to vector<4x128xf32>
      %c4 = arith.constant 4 : index
      %c0_55 = arith.constant 0 : index
      %64 = vector.load %arg9[%c4, %c0_55] : memref<16x128xf32, #tpu.memory_space<vmem>>, vector<4x128xf32>
      tpu.vector_store %arg9[%c4, %c0_55], %63 {strides = array<i32>} : memref<16x128xf32, #tpu.memory_space<vmem>>, vector<4x128xf32>,
      %cst_56 = arith.constant 0.000000e+00 : f32
      %65 = vector.broadcast %cst_56 : f32 to vector<4x128xf32>
      %c12 = arith.constant 12 : index
      %c0_57 = arith.constant 0 : index
      %66 = vector.load %arg9[%c12, %c0_57] : memref<16x128xf32, #tpu.memory_space<vmem>>, vector<4x128xf32>
      tpu.vector_store %arg9[%c12, %c0_57], %65 {strides = array<i32>} : memref<16x128xf32, #tpu.memory_space<vmem>>, vector<4x128xf32>,
      %c0_i32_58 = arith.constant 0 : i32
      %c0_i32_59 = arith.constant 0 : i32
      %c0_i32_60 = arith.constant 0 : i32
      %c0_i32_61 = arith.constant 0 : i32
      %67 = tpu.memref_slice %arg4[%c0_i32_60, %c0_i32_61] : memref<32x128xf32, #tpu.memory_space<any>> -> memref<1x128xf32, #tpu.memory_space<any>>
      %c0_i32_62 = arith.constant 0 : i32
      %c0_i32_63 = arith.constant 0 : i32
      %68 = tpu.memref_slice %arg9[%c0_i32_62, %c0_i32_63] : memref<16x128xf32, #tpu.memory_space<vmem>> -> memref<1x128xf32, #tpu.memory_space<vmem>>
      %69 = tpu.memref_slice %arg11[%c0_i32_58, %c0_i32_59] : memref<2x4x!tpu.dma_semaphore, #tpu.memory_space<semaphore_mem>> -> memref<1x1x!tpu.dma_semaphore, #tpu.memory_space<semaphore_mem>>
      %70 = tpu.memref_squeeze %69 : memref<1x1x!tpu.dma_semaphore, #tpu.memory_space<semaphore_mem>> -> memref<!tpu.dma_semaphore, #tpu.memory_space<semaphore_mem>>
      tpu.wait_dma2 semaphore(%70 : memref<!tpu.dma_semaphore, #tpu.memory_space<semaphore_mem>>) src(%67 : memref<1x128xf32, #tpu.memory_space<any>>) dst(%68 : memref<1x128xf32, #tpu.memory_space<vmem>>)
      %c0_i32_64 = arith.constant 0 : i32
      %c1_i32_65 = arith.constant 1 : i32
      %c0_i32_66 = arith.constant 0 : i32
      %c0_i32_67 = arith.constant 0 : i32
      %71 = tpu.memref_slice %arg4[%c0_i32_66, %c0_i32_67] : memref<32x128xf32, #tpu.memory_space<any>> -> memref<1x128xf32, #tpu.memory_space<any>>
      %c1_i32_68 = arith.constant 1 : i32
      %c0_i32_69 = arith.constant 0 : i32
      %72 = tpu.memref_slice %arg9[%c1_i32_68, %c0_i32_69] : memref<16x128xf32, #tpu.memory_space<vmem>> -> memref<1x128xf32, #tpu.memory_space<vmem>>
      %73 = tpu.memref_slice %arg11[%c0_i32_64, %c1_i32_65] : memref<2x4x!tpu.dma_semaphore, #tpu.memory_space<semaphore_mem>> -> memref<1x1x!tpu.dma_semaphore, #tpu.memory_space<semaphore_mem>>
      %74 = tpu.memref_squeeze %73 : memref<1x1x!tpu.dma_semaphore, #tpu.memory_space<semaphore_mem>> -> memref<!tpu.dma_semaphore, #tpu.memory_space<semaphore_mem>>
      tpu.wait_dma2 semaphore(%74 : memref<!tpu.dma_semaphore, #tpu.memory_space<semaphore_mem>>) src(%71 : memref<1x128xf32, #tpu.memory_space<any>>) dst(%72 : memref<1x128xf32, #tpu.memory_space<vmem>>)
      %c0_i32_70 = arith.constant 0 : i32
      %c2_i32_71 = arith.constant 2 : i32
      %c0_i32_72 = arith.constant 0 : i32
      %c0_i32_73 = arith.constant 0 : i32
      %75 = tpu.memref_slice %arg4[%c0_i32_72, %c0_i32_73] : memref<32x128xf32, #tpu.memory_space<any>> -> memref<1x128xf32, #tpu.memory_space<any>>
      %c2_i32_74 = arith.constant 2 : i32
      %c0_i32_75 = arith.constant 0 : i32
      %76 = tpu.memref_slice %arg9[%c2_i32_74, %c0_i32_75] : memref<16x128xf32, #tpu.memory_space<vmem>> -> memref<1x128xf32, #tpu.memory_space<vmem>>
      %77 = tpu.memref_slice %arg11[%c0_i32_70, %c2_i32_71] : memref<2x4x!tpu.dma_semaphore, #tpu.memory_space<semaphore_mem>> -> memref<1x1x!tpu.dma_semaphore, #tpu.memory_space<semaphore_mem>>
      %78 = tpu.memref_squeeze %77 : memref<1x1x!tpu.dma_semaphore, #tpu.memory_space<semaphore_mem>> -> memref<!tpu.dma_semaphore, #tpu.memory_space<semaphore_mem>>
      tpu.wait_dma2 semaphore(%78 : memref<!tpu.dma_semaphore, #tpu.memory_space<semaphore_mem>>) src(%75 : memref<1x128xf32, #tpu.memory_space<any>>) dst(%76 : memref<1x128xf32, #tpu.memory_space<vmem>>)
      %c0_i32_76 = arith.constant 0 : i32
      %c3_i32_77 = arith.constant 3 : i32
      %c0_i32_78 = arith.constant 0 : i32
      %c0_i32_79 = arith.constant 0 : i32
      %79 = tpu.memref_slice %arg4[%c0_i32_78, %c0_i32_79] : memref<32x128xf32, #tpu.memory_space<any>> -> memref<1x128xf32, #tpu.memory_space<any>>
      %c3_i32_80 = arith.constant 3 : i32
      %c0_i32_81 = arith.constant 0 : i32
      %80 = tpu.memref_slice %arg9[%c3_i32_80, %c0_i32_81] : memref<16x128xf32, #tpu.memory_space<vmem>> -> memref<1x128xf32, #tpu.memory_space<vmem>>
      %81 = tpu.memref_slice %arg11[%c0_i32_76, %c3_i32_77] : memref<2x4x!tpu.dma_semaphore, #tpu.memory_space<semaphore_mem>> -> memref<1x1x!tpu.dma_semaphore, #tpu.memory_space<semaphore_mem>>
      %82 = tpu.memref_squeeze %81 : memref<1x1x!tpu.dma_semaphore, #tpu.memory_space<semaphore_mem>> -> memref<!tpu.dma_semaphore, #tpu.memory_space<semaphore_mem>>
      tpu.wait_dma2 semaphore(%82 : memref<!tpu.dma_semaphore, #tpu.memory_space<semaphore_mem>>) src(%79 : memref<1x128xf32, #tpu.memory_space<any>>) dst(%80 : memref<1x128xf32, #tpu.memory_space<vmem>>)
    } else {
    }
    %c1_i32 = arith.constant 1 : i32
    %3 = arith.cmpi eq, %arg1, %c1_i32 : i32
    %4 = arith.extui %3 : i1 to i32
    %c0_i32_1 = arith.constant 0 : i32
    %5 = arith.cmpi ne, %4, %c0_i32_1 : i32
    scf.if %5 {
      %c1_i32_10 = arith.constant 1 : i32
      %c0_i32_11 = arith.constant 0 : i32
      %c0_i32_12 = arith.constant 0 : i32
      %c0_i32_13 = arith.constant 0 : i32
      %19 = tpu.memref_slice %arg4[%c0_i32_12, %c0_i32_13] : memref<32x128xf32, #tpu.memory_space<any>> -> memref<1x128xf32, #tpu.memory_space<any>>
      %c8_i32_14 = arith.constant 8 : i32
      %c0_i32_15 = arith.constant 0 : i32
      %20 = tpu.memref_slice %arg9[%c8_i32_14, %c0_i32_15] : memref<16x128xf32, #tpu.memory_space<vmem>> -> memref<1x128xf32, #tpu.memory_space<vmem>>
      %21 = tpu.memref_slice %arg11[%c1_i32_10, %c0_i32_11] : memref<2x4x!tpu.dma_semaphore, #tpu.memory_space<semaphore_mem>> -> memref<1x1x!tpu.dma_semaphore, #tpu.memory_space<semaphore_mem>>
      %22 = tpu.memref_squeeze %21 : memref<1x1x!tpu.dma_semaphore, #tpu.memory_space<semaphore_mem>> -> memref<!tpu.dma_semaphore, #tpu.memory_space<semaphore_mem>>
      tpu.wait_dma2 semaphore(%22 : memref<!tpu.dma_semaphore, #tpu.memory_space<semaphore_mem>>) src(%19 : memref<1x128xf32, #tpu.memory_space<any>>) dst(%20 : memref<1x128xf32, #tpu.memory_space<vmem>>)
      %c1_i32_16 = arith.constant 1 : i32
      %c1_i32_17 = arith.constant 1 : i32
      %c0_i32_18 = arith.constant 0 : i32
      %c0_i32_19 = arith.constant 0 : i32
      %23 = tpu.memref_slice %arg4[%c0_i32_18, %c0_i32_19] : memref<32x128xf32, #tpu.memory_space<any>> -> memref<1x128xf32, #tpu.memory_space<any>>
      %c9_i32 = arith.constant 9 : i32
      %c0_i32_20 = arith.constant 0 : i32
      %24 = tpu.memref_slice %arg9[%c9_i32, %c0_i32_20] : memref<16x128xf32, #tpu.memory_space<vmem>> -> memref<1x128xf32, #tpu.memory_space<vmem>>
      %25 = tpu.memref_slice %arg11[%c1_i32_16, %c1_i32_17] : memref<2x4x!tpu.dma_semaphore, #tpu.memory_space<semaphore_mem>> -> memref<1x1x!tpu.dma_semaphore, #tpu.memory_space<semaphore_mem>>
      %26 = tpu.memref_squeeze %25 : memref<1x1x!tpu.dma_semaphore, #tpu.memory_space<semaphore_mem>> -> memref<!tpu.dma_semaphore, #tpu.memory_space<semaphore_mem>>
      tpu.wait_dma2 semaphore(%26 : memref<!tpu.dma_semaphore, #tpu.memory_space<semaphore_mem>>) src(%23 : memref<1x128xf32, #tpu.memory_space<any>>) dst(%24 : memref<1x128xf32, #tpu.memory_space<vmem>>)
      %c1_i32_21 = arith.constant 1 : i32
      %c2_i32 = arith.constant 2 : i32
      %c0_i32_22 = arith.constant 0 : i32
      %c0_i32_23 = arith.constant 0 : i32
      %27 = tpu.memref_slice %arg4[%c0_i32_22, %c0_i32_23] : memref<32x128xf32, #tpu.memory_space<any>> -> memref<1x128xf32, #tpu.memory_space<any>>
      %c10_i32 = arith.constant 10 : i32
      %c0_i32_24 = arith.constant 0 : i32
      %28 = tpu.memref_slice %arg9[%c10_i32, %c0_i32_24] : memref<16x128xf32, #tpu.memory_space<vmem>> -> memref<1x128xf32, #tpu.memory_space<vmem>>
      %29 = tpu.memref_slice %arg11[%c1_i32_21, %c2_i32] : memref<2x4x!tpu.dma_semaphore, #tpu.memory_space<semaphore_mem>> -> memref<1x1x!tpu.dma_semaphore, #tpu.memory_space<semaphore_mem>>
      %30 = tpu.memref_squeeze %29 : memref<1x1x!tpu.dma_semaphore, #tpu.memory_space<semaphore_mem>> -> memref<!tpu.dma_semaphore, #tpu.memory_space<semaphore_mem>>
      tpu.wait_dma2 semaphore(%30 : memref<!tpu.dma_semaphore, #tpu.memory_space<semaphore_mem>>) src(%27 : memref<1x128xf32, #tpu.memory_space<any>>) dst(%28 : memref<1x128xf32, #tpu.memory_space<vmem>>)
      %c1_i32_25 = arith.constant 1 : i32
      %c3_i32 = arith.constant 3 : i32
      %c0_i32_26 = arith.constant 0 : i32
      %c0_i32_27 = arith.constant 0 : i32
      %31 = tpu.memref_slice %arg4[%c0_i32_26, %c0_i32_27] : memref<32x128xf32, #tpu.memory_space<any>> -> memref<1x128xf32, #tpu.memory_space<any>>
      %c11_i32 = arith.constant 11 : i32
      %c0_i32_28 = arith.constant 0 : i32
      %32 = tpu.memref_slice %arg9[%c11_i32, %c0_i32_28] : memref<16x128xf32, #tpu.memory_space<vmem>> -> memref<1x128xf32, #tpu.memory_space<vmem>>
      %33 = tpu.memref_slice %arg11[%c1_i32_25, %c3_i32] : memref<2x4x!tpu.dma_semaphore, #tpu.memory_space<semaphore_mem>> -> memref<1x1x!tpu.dma_semaphore, #tpu.memory_space<semaphore_mem>>
      %34 = tpu.memref_squeeze %33 : memref<1x1x!tpu.dma_semaphore, #tpu.memory_space<semaphore_mem>> -> memref<!tpu.dma_semaphore, #tpu.memory_space<semaphore_mem>>
      tpu.wait_dma2 semaphore(%34 : memref<!tpu.dma_semaphore, #tpu.memory_space<semaphore_mem>>) src(%31 : memref<1x128xf32, #tpu.memory_space<any>>) dst(%32 : memref<1x128xf32, #tpu.memory_space<vmem>>)
    } else {
    }
    %c8_i32 = arith.constant 8 : i32
    %6 = arith.muli %arg1, %c8_i32 : i32
    %7 = tpu.assume_multiple %6, 8 : i32
    %8 = arith.index_cast %7 : i32 to index
    %c0 = arith.constant 0 : index
    %9 = vector.load %arg9[%8, %c0] : memref<16x128xf32, #tpu.memory_space<vmem>>, vector<8x128xf32>
    %c0_2 = arith.constant 0 : index
    %c0_3 = arith.constant 0 : index
    %10 = vector.load %arg10[%c0_2, %c0_3] : memref<8x128xf32, #tpu.memory_space<vmem>>, vector<8x128xf32>
    %11 = arith.truncf %9 : vector<8x128xf32> to vector<8x128xbf16>
    %c0_4 = arith.constant 0 : index
    %c0_5 = arith.constant 0 : index
    %12 = vector.load %arg5[%c0_4, %c0_5] : memref<128x128xbf16, #tpu.memory_space<vmem>>, vector<128x128xbf16>
    %cst = arith.constant dense<0.000000e+00> : vector<8x128xf32>
    %13 = tpu.matmul %11, %12, %cst {dimension_numbers = #tpu.dot_dimension_numbers<[1], [0], [0], [1], [0, 0, 1, 1], [], []>} : vector<8x128xbf16>, vector<128x128xbf16>, vector<8x128xf32> -> vector<8x128xf32>
    %14 = arith.addf %10, %13 : vector<8x128xf32>
    %c0_6 = arith.constant 0 : index
    %c0_7 = arith.constant 0 : index
    %15 = vector.load %arg10[%c0_6, %c0_7] : memref<8x128xf32, #tpu.memory_space<vmem>>, vector<8x128xf32>
    tpu.vector_store %arg10[%c0_6, %c0_7], %14 {strides = array<i32>} : memref<8x128xf32, #tpu.memory_space<vmem>>, vector<8x128xf32>,
    %c1_i32_8 = arith.constant 1 : i32
    %16 = arith.cmpi eq, %arg1, %c1_i32_8 : i32
    %17 = arith.extui %16 : i1 to i32
    %c0_i32_9 = arith.constant 0 : i32
    %18 = arith.cmpi ne, %17, %c0_i32_9 : i32
    scf.if %18 {
      %c0_10 = arith.constant 0 : index
      %c0_11 = arith.constant 0 : index
      %19 = vector.load %arg10[%c0_10, %c0_11] : memref<8x128xf32, #tpu.memory_space<vmem>>, vector<8x128xf32>
      %cst_12 = arith.constant 0.000000e+00 : f32
      %20 = vector.broadcast %cst_12 : f32 to vector<8x128xf32>
      %21 = arith.maximumf %19, %20 : vector<8x128xf32>
      %22 = arith.truncf %21 : vector<8x128xf32> to vector<8x128xbf16>
      %c0_13 = arith.constant 0 : index
      %c0_14 = arith.constant 0 : index
      %23 = vector.load %arg7[%c0_13, %c0_14] : memref<128x128xbf16, #tpu.memory_space<vmem>>, vector<128x128xbf16>
      %cst_15 = arith.constant dense<0.000000e+00> : vector<8x128xf32>
      %24 = tpu.matmul %22, %23, %cst_15 {dimension_numbers = #tpu.dot_dimension_numbers<[1], [0], [0], [1], [0, 0, 1, 1], [], []>} : vector<8x128xbf16>, vector<128x128xbf16>, vector<8x128xf32> -> vector<8x128xf32>
      %c0_16 = arith.constant 0 : index
      %c0_17 = arith.constant 0 : index
      %25 = vector.load %arg8[%c0_16, %c0_17] : memref<8x128xf32, #tpu.memory_space<vmem>>, vector<8x128xf32>
      tpu.vector_store %arg8[%c0_16, %c0_17], %24 {strides = array<i32>} : memref<8x128xf32, #tpu.memory_space<vmem>>, vector<8x128xf32>,
    } else {
    }
    return
  }
  func.func @transform_1(%arg0: i32, %arg1: i32, %arg2: memref<4xi32, #tpu.memory_space<smem>>, %arg3: memref<4xi32, #tpu.memory_space<smem>>) -> (i32, i32) {
    %c0_i32 = arith.constant 0 : i32
    return %arg1, %arg0 : i32, i32
  }
  func.func @transform_2(%arg0: i32, %arg1: i32, %arg2: memref<4xi32, #tpu.memory_space<smem>>, %arg3: memref<4xi32, #tpu.memory_space<smem>>) -> (i32, i32) {
    %c0_i32 = arith.constant 0 : i32
    %c0_i32_0 = arith.constant 0 : i32
    return %c0_i32, %arg0 : i32, i32
  }
  func.func @transform_3(%arg0: i32, %arg1: i32, %arg2: memref<4xi32, #tpu.memory_space<smem>>, %arg3: memref<4xi32, #tpu.memory_space<smem>>) -> (i32, i32) {
    %c0_i32 = arith.constant 0 : i32
    %c0_i32_0 = arith.constant 0 : i32
    return %arg0, %c0_i32 : i32, i32
  }
  func.func @transform_4(%arg0: i32, %arg1: i32, %arg2: memref<4xi32, #tpu.memory_space<smem>>, %arg3: memref<4xi32, #tpu.memory_space<smem>>) -> (i32, i32) {
    %c0_i32 = arith.constant 0 : i32
    %c0_i32_0 = arith.constant 0 : i32
    return %arg0, %c0_i32 : i32, i32
  }
}

</mosaic_0001>

<bundles_post_ra>
// kernel: tpu_custom_call.1
= control target key start
LH: loop header
LB: loop body
LE: loop exit
PB: predicated region body
PF: predicated region fallthrough
CT: control target
= control target key end

     0   :  { %s1824_s0 = inlined_call_operand.hbm [shape: s32[4], index: 0, kind: input, shape index: {}]   ;;  %s1825_s2 = inlined_call_operand.hbm [shape: f32[32,128], index: 2, kind: input, shape index: {}]   ;;  %s1826_s3 = inlined_call_operand.hbm [shape: bf16[256,128], index: 3, kind: input, shape index: {}]   ;;  %s1827_s4 = inlined_call_operand.vmem [shape: f32[1,128], index: 4, kind: input, shape index: {}]   ;;  %s1828_s5 = inlined_call_operand.hbm [shape: bf16[128,128], index: 5, kind: input, shape index: {}]   ;;  %s1829_s6 = inlined_call_operand.hbm [shape: f32[8,128], index: 6, kind: output, shape index: {}]   ;;  %s1830_s1 = inlined_call_operand.vmem [shape: s32[4], index: 1, kind: input, shape index: {}]  }
   0x1   :  { %1836 = sst [smem:[#allocation44_spill]] %s1826_s3  ;;  %s1034_s23 = scalar_lea.hbm %s1824_s0, 16 }
   0x2   :  { %p1035_p0 = scmp.ne.s32.totalorder %s1824_s0, %s1034_s23  ;;  %p1038_p1 = scmp.lt.u32.totalorder %s1034_s23, %s1824_s0 }
   0x4   :  { %p1040_p2 = pnand %p1038_p1, %p1035_p0 }
   0x6   :  { %1043 = shalt.err (!%p1040_p2)  }
   0x7   :  { %s1418_s28 = smov [#allocation6]   ;;  %s13_s9 = sshll.u32 %s1830_s1, 4  ;;  %s14_s9 = int_to_ptr.vmem [resolvable:$true] %s13_s9 }
   0x8   :  { %12 = dma.hbm_to_smem %s1824_s0, 16, %s1418_s28, [#allocation5] }
   0x9   :  { %s1044_s10 = scalar_lea.vmem %s14_s9, 16  ;;  %p1049_p4 = scmp.lt.s32.totalorder %s14_s9, %s14_s9 }
   0xa   :  { %p1045_p3 = scmp.ne.s32.totalorder %s14_s9, %s1044_s10  ;;  %p1050_p5 = scmp.lt.s32.totalorder %s1044_s10, %s1044_s10 }
   0xc   :  { %p1051_p6 = por %p1050_p5, %p1049_p4 }
   0xe   :  { %p1052_p7 = pnand %p1051_p6, %p1045_p3 }
  0x10   :  { %1055 = shalt.err (!%p1052_p7)  }
  0x11   :  { %s1419_s11 = smov [#allocation7]  }
  0x12   :  { %16 = dma.vmem_to_smem %s14_s9, 16, %s1419_s11, [#allocation5] }
  0x13   :  { %1356 = dma.done.wait [#allocation5], 32 }
  0x14   :  { %1357 = vsyncadd [#allocation5], 4294967264 }
  0x15   :  { %18 = sfence }
  0x16   :  { %19 = vsyncpa [#allocation9], 0 }
  0x17   :  { %21 = vsyncpa [#allocation9 + $0x1], 0 }
  0x18   :  { %22 = vsyncpa [#allocation12], 0 }
  0x19   :  { %23 = vsyncpa [#allocation10], 0  ;;  %s1488_s0 = smov 0   ;;  %s1490_s1 = smov 0  }
  0x1a   :  { %s1492_s12 = smov 0   ;;  %s1494_s13 = smov 0  }
  0x1b   :  { %s1496_s14 = smov 0   ;;  %s1498_s15 = smov 0  }
  0x1c LB: > { %s1835_s16 = sadd.s32 4294967295, %s1416_s15   ;;  %p63_p8 = scmp.ne.s32.totalorder %s1400_s1, %s1396_s0  ;;  %s1416_s15 = sphi %s1498_s15, %s29_s15   ;;  %s1412_s14 = sphi %s1496_s14, %s1852_s14   ;;  %s1408_s13 = sphi %s1494_s13, %s1851_s13   ;;  %s1404_s12 = sphi %s1492_s12, %s1850_s12   ;;  %s1400_s1 = sphi %s1490_s1, %s1849_s1   ;;  %s1396_s0 = sphi %s1488_s0, %s1848_s0  }
  0x1d   : > { %p1520_p9 = scmp.eq.s32.totalorder %s1835_s16, 0  ;;  %p806_p10 = scmp.ge.s32.totalorder %s1416_s15, 1 }
  0x1e   : > { %p152_p11 = scmp.lt.s32.totalorder %s1416_s15, 3  ;;  %s1420_s20 = smov [#allocation11]  }
  0x1f   : > { %s1837_s17 = scalar_select %p1520_p9, 1, 0 }
  0x20   : > { %p1528_p12 = por %p1520_p9, %p63_p8  ;;  %p1532_p13 = pnand %p806_p10, %p152_p11 }
  0x21   : > { %s173_s21 = sshll.u32 %s1420_s20, 4  ;;  %s38_s23 = sadd.s32 1, %s1412_s14  ;;  %s174_s21 = int_to_ptr.vmem [resolvable:$true] %s173_s21 }
  0x22   : > { %s1838_s18 = scalar_select %p1528_p12, 1, 0 }
  0x23   : > { %s1839_s19 = scalar_select %p1532_p13, 1, 0 }
  0x24   : > { %p937_p0 = pneg %p1532_p13  ;;  %s1056_s26 = scalar_lea.hbm %s1828_s5, 1024 }
  0x25   : > { %p1057_p2 = scmp.ne.s32.totalorder %s1828_s5, %s1056_s26  ;;  %p1063_p6 = scmp.lt.u32.totalorder %s1056_s26, %s1828_s5 }
  0x26   : > { %p1540_p1 = pnand %p937_p0, %p1520_p9 }
  0x28   : > { %p1058_p3 = pneg %p1540_p1 }
  0x2a   : > { %p1059_p4 = pnand %p1058_p3, %p1057_p2 }
  0x2c   : > { %p1060_p5 = pneg %p1059_p4 }
  0x2e   : > { %p1065_p7 = pnand %p1063_p6, %p1060_p5 }
  0x30   : > { %1068 = shalt.err (!%p1065_p7)
}
  0x31   : > { %s1069_s7 = scalar_lea.vmem %s174_s21, 1024  ;;  %p1077_p0 = scmp.lt.s32.totalorder %s174_s21, %s174_s21 }
  0x32   : > { %p1070_p8 = scmp.ne.s32.totalorder %s174_s21, %s1069_s7  ;;  %p1078_p9 = scmp.lt.s32.totalorder %s1069_s7, %s1069_s7 }
  0x34   : > { %p1072_p10 = pnand %p1070_p8, %p1058_p3  ;;  %p1079_p12 = por %p1078_p9, %p1077_p0 }
  0x36   : > { %p1073_p11 = pneg %p1072_p10 }
  0x38   : > { %p1080_p13 = pnand %p1079_p12, %p1073_p11 }
  0x3a   : > { %1083 = shalt.err (!%p1080_p13)
}
  0x3b   : > { %s1421_s8 = smov 64   ;;  %s1422_s9 = smov 4  }
  0x3c   : > { %940 = dma.hbm_to_vmem [thread:$0]  (!%p1540_p1), %s1828_s5, 1024, %s174_s21, [#allocation12], %s1421_s8, %s1421_s8, %s1422_s9  }
  0x3d   : > { %p39_p9 = scmp.ge.s32.totalorder %s38_s23, 2  ;;  %s50_s0 = sadd.s32 1, %s1404_s12 }
  0x3e   : > { %p57_p12 = scmp.ne.s32.totalorder %s1404_s12, %s1400_s1  ;;  %p58_p13 = scmp.eq.s32.totalorder %s1416_s15, 0 }
  0x3f   : > { %s1854_s23 = smov (%p39_p9, %s38_s23), 0  ;;  %p946_p3 = scmp.lt.s32.totalorder %s1416_s15, 2 }
  0x40   : > { %p59_p2 = por %p58_p13, %p57_p12  ;;  %s45_s20 = ssub.s32 %s1412_s14, %s1854_s23 }
  0x41   : > { %s187_s24 = sand.u32 1, %s1404_s12   ;;  %p48_p4 = scmp.eq.s32.totalorder %s45_s20, 0 }
  0x42   : > { %s810_s22 = sshll.u32 %s187_s24, 6  ;;  %s863_s25 = sshll.u32 %s1412_s14, 10 }
  0x43   : > { %s1576_s26 = scalar_select %p48_p4, %s1404_s12, %s50_s0  }
  0x44   : > { %s1841_s3 = sld [smem:[#allocation44_spill]]  ;;  %s191_s29 = scalar_lea.vmem [#allocation8], %s810_s22 }
  0x45   : > { %s199_s30 = sshll.u32 %s191_s29, 4  ;;  %p1583_p1 = pnand %p946_p3, %p59_p2  ;;  %s1587_s30 = int_to_ptr.vmem [resolvable:$true] %s199_s30 }
  0x46   : > { %s1589_s10 = scalar_lea.sflag [#allocation9], %s187_s24 }
  0x47   : > { %p1086_p6 = pneg %p1583_p1 }
  0x4a   : > { %s1581_s21 = scalar_lea.hbm %s1841_s3, %s863_s25  ;;  %s1089_s22 = scalar_lea.hbm %s1841_s3, 2048 }
  0x4b   : > { %s1084_s11 = scalar_lea.hbm %s1581_s21, 1024  ;;  %p1090_p10 = scmp.lt.u32.totalorder %s1581_s21, %s1841_s3 }
  0x4c   : > { %p1085_p5 = scmp.ne.s32.totalorder %s1581_s21, %s1084_s11  ;;  %p1091_p11 = scmp.lt.u32.totalorder %s1089_s22, %s1084_s11 }
  0x4d   : > { %p1093_p9 = scmp.lt.u32.totalorder %s1084_s11, %s1581_s21 }
  0x4e   : > { %p1087_p7 = pnand %p1086_p6, %p1085_p5  ;;  %p1092_p0 = por %p1091_p11, %p1090_p10 }
  0x50   : > { %p1088_p8 = pneg %p1087_p7  ;;  %p1094_p12 = por %p1093_p9, %p1092_p0 }
  0x52   : > { %p1095_p13 = pnand %p1094_p12, %p1088_p8 }
  0x54   : > { %1098 = shalt.err (!%p1095_p13)
}
  0x55   : > { %s1099_s24 = scalar_lea.vmem %s1587_s30, 1024  ;;  %s1423_s28 = smov [#allocation8]  }
  0x56   : > { %p1100_p2 = scmp.ne.s32.totalorder %s1587_s30, %s1099_s24  ;;  %s1104_s29 = sshll.u32 %s1423_s28, 4  ;;  %s1105_s29 = int_to_ptr.vmem [resolvable:$false] %s1104_s29 }
  0x57   : > { %s1106_s0 = scalar_lea.vmem %s1105_s29, 2048  ;;  %p1107_p5 = scmp.lt.s32.totalorder %s1587_s30, %s1105_s29 }
  0x58   : > { %p1102_p3 = pnand %p1100_p2, %p1086_p6  ;;  %p1108_p7 = scmp.lt.s32.totalorder %s1106_s0, %s1099_s24 }
  0x5a   : > { %p1103_p4 = pneg %p1102_p3  ;;  %p1109_p10 = por %p1108_p7, %p1107_p5 }
  0x5c   : > { %p1110_p11 = pnand %p1109_p10, %p1103_p4 }
  0x5e   : > { %1113 = shalt.err (!%p1110_p11)
}
  0x5f   : > { %944 = dma.hbm_to_vmem [thread:$0]  (!%p1583_p1), %s1581_s21, 1024, %s1587_s30, %s1589_s10, %s1421_s8, %s1421_s8, %s1422_s9  }
  0x60   : > { %p1843_p6 = scmp.ne.s32.totalorder %s1839_s19, 0 }
  0x61   : > { %s213_s11 = sand.u32 (!%p1843_p6), 1, %s1400_s1   ;;  %p1844_p8 = scmp.ne.s32.totalorder (!%p1843_p6), %s1838_s18, 0 }
  0x62   : > { %211 = sbr.rel (%p1843_p6) target bundleno = 804 (0x324), region = 32  ;;  %s814_s20 = sshll.u32 (!%p1843_p6), %s213_s11, 6 }
  0x63   : > { %s214_s22 = scalar_lea.sflag (!%p1843_p6), [#allocation9], %s213_s11  ;;  %s1623_s25 = scalar_lea.vmem (!%p1843_p6), [#allocation8], %s814_s20 }
  0x69   : > { %1359 = dma.done.wait (%p1844_p8), %s214_s22, 1024  }
  0x6a   : > { %1361 = vsyncadd (%p1844_p8), %s214_s22, 4294966272  ;;  %p1845_p0 = scmp.ne.s32.totalorder %s1837_s17, 0 }
  0x6c   : > { %1363 = dma.done.wait (%p1845_p0), [#allocation12], 1024  }
  0x6d   : > { %1365 = vsyncadd (%p1845_p0), [#allocation12], 4294966272  ;;  %p816_p1 = scmp.ne.s32.totalorder %s1408_s13, 0 }
  0x6e   : > { %s252_s19 = sld [smem:[#allocation6]] (!%p816_p1)  ;;  %v831_v0 = vld [vmem:[%s1827_s4] ss:$0 sm:$0xff] (!%p816_p1)  ;;  %s1424_s21 = smov (!%p816_p1), [#allocation2]  }
  0x6f   : > { %251 = sbr.rel (%p816_p1) target bundleno = 296 (0x128), region = 44  ;;  %s262_s30 = sshll.u32 (!%p816_p1), %s1424_s21, 4  ;;  %385 = vst [vmem:[#allocation3] sm:$0xff] (!%p816_p1), %v831_v0  ;;  %s1639_s30 = int_to_ptr.vmem [resolvable:$true] %s262_s30 }
  0x70   : > { %s1637_s7 = sld [smem:[#allocation6 + $0x1]] (!%p816_p1)  ;;  %s1425_s18 = smov (!%p816_p1), [#allocation2 + $0x1]  }
  0x71   : > { %s278_s10 = sshll.u32 (!%p816_p1), %s1425_s18, 4  ;;  %s1641_s17 = sld [smem:[#allocation6 + $0x2]] (!%p816_p1)  ;;  %s1643_s10 = int_to_ptr.vmem [resolvable:$true] %s278_s10 }
  0x72   : > { %s1426_s27 = smov (!%p816_p1), [#allocation2 + $0x2]   ;;  %s1645_s28 = sld [smem:[#allocation6 + $0x3]] (!%p816_p1) }
  0x73   : > { %s294_s24 = sshll.u32 (!%p816_p1), %s1426_s27, 4  ;;  %s1656_s18 = scalar_lea.hbm (!%p816_p1), %s1825_s2, 512  ;;  %s1647_s24 = int_to_ptr.vmem [resolvable:$true] %s294_s24 }
  0x74   : > { %s817_s29 = sshll.u32 (!%p816_p1), %s252_s19, 4 }
  0x75   : > { %s254_s20 = scalar_lea.hbm (!%p816_p1), %s1825_s2, %s817_s29 }
  0x76   : > { %s819_s22 = sshll.u32 %s1637_s7, 4  ;;  %s1114_s8 = scalar_lea.hbm %s254_s20, 16 }
  0x77   : > { %p1115_p9 = scmp.ne.s32.totalorder %s254_s20, %s1114_s8  ;;  %p1117_p12 = scmp.lt.u32.totalorder %s254_s20, %s1825_s2 }
  0x78   : > { %p1118_p13 = scmp.lt.u32.totalorder %s1656_s18, %s1114_s8  ;;  %p1120_p3 = scmp.lt.u32.totalorder %s1114_s8, %s254_s20 }
  0x7a   : > { %p1119_p2 = por %p1118_p13, %p1117_p12 }
  0x7c   : > { %p1121_p4 = por %p1120_p3, %p1119_p2 }
  0x7e   : > { %p1122_p5 = pnand %p1121_p4, %p1115_p9 }
  0x80   : > { %1125 = shalt.err (!%p1122_p5)  }
  0x81   : > { %s1126_s19 = scalar_lea.vmem %s1639_s30, 16  ;;  %s1665_s7 = scalar_lea.vmem %s1639_s30, 256 }
  0x82   : > { %p1127_p7 = scmp.ne.s32.totalorder %s1639_s30, %s1126_s19  ;;  %p1131_p10 = scmp.lt.s32.totalorder %s1639_s30, %s1639_s30 }
  0x83   : > { %p1132_p11 = scmp.lt.s32.totalorder %s1665_s7, %s1126_s19 }
  0x85   : > { %p1133_p6 = por %p1132_p11, %p1131_p10 }
  0x87   : > { %p1134_p8 = pnand %p1133_p6, %p1127_p7 }
  0x89   : > { %1137 = shalt.err (!%p1134_p8)  }
  0x8a   : > { %265 = dma.hbm_to_vmem [thread:$0]  %s254_s20, 16, %s1639_s30, [#allocation4] }
  0x8b   : > { %s268_s27 = scalar_lea.hbm %s1825_s2, %s819_s22  ;;  %s821_s29 = sshll.u32 %s1641_s17, 4 }
  0x8c   : > { %s1138_s0 = scalar_lea.hbm %s268_s27, 16  ;;  %p1141_p1 = scmp.lt.u32.totalorder %s268_s27, %s1825_s2 }
  0x8d   : > { %p1139_p0 = scmp.ne.s32.totalorder %s268_s27, %s1138_s0  ;;  %p1142_p9 = scmp.lt.u32.totalorder %s1656_s18, %s1138_s0 }
  0x8e   : > { %p1144_p13 = scmp.lt.u32.totalorder %s1138_s0, %s268_s27 }
  0x8f   : > { %p1143_p12 = por %p1142_p9, %p1141_p1 }
  0x91   : > { %p1145_p2 = por %p1144_p13, %p1143_p12 }
  0x93   : > { %p1146_p3 = pnand %p1145_p2, %p1139_p0 }
  0x95   : > { %1149 = shalt.err (!%p1146_p3)  }
  0x96   : > { %s1150_s20 = scalar_lea.vmem %s1643_s10, 16  ;;  %p1155_p5 = scmp.lt.s32.totalorder %s1643_s10, %s1639_s30 }
  0x97   : > { %p1151_p4 = scmp.ne.s32.totalorder %s1643_s10, %s1150_s20  ;;  %p1156_p7 = scmp.lt.s32.totalorder %s1665_s7, %s1150_s20 }
  0x99   : > { %p1157_p10 = por %p1156_p7, %p1155_p5 }
  0x9b   : > { %p1158_p11 = pnand %p1157_p10, %p1151_p4 }
  0x9d   : > { %1161 = shalt.err (!%p1158_p11)  }
  0x9e   : > { %281 = dma.hbm_to_vmem [thread:$0]  %s268_s27, 16, %s1643_s10, [#allocation4 + $0x1] }
  0x9f   : > { %s284_s9 = scalar_lea.hbm %s1825_s2, %s821_s29  ;;  %s823_s21 = sshll.u32 %s1645_s28, 4 }
  0xa0   : > { %s1162_s19 = scalar_lea.hbm %s284_s9, 16  ;;  %p1165_p8 = scmp.lt.u32.totalorder %s284_s9, %s1825_s2 }
  0xa1   : > { %p1163_p6 = scmp.ne.s32.totalorder %s284_s9, %s1162_s19  ;;  %p1166_p0 = scmp.lt.u32.totalorder %s1656_s18, %s1162_s19 }
  0xa2   : > { %p1168_p9 = scmp.lt.u32.totalorder %s1162_s19, %s284_s9 }
  0xa3   : > { %p1167_p1 = por %p1166_p0, %p1165_p8 }
  0xa5   : > { %p1169_p12 = por %p1168_p9, %p1167_p1 }
  0xa7   : > { %p1170_p13 = pnand %p1169_p12, %p1163_p6 }
  0xa9   : > { %1173 = shalt.err (!%p1170_p13)  }
  0xaa   : > { %s1174_s10 = scalar_lea.vmem %s1647_s24, 16  ;;  %p1179_p3 = scmp.lt.s32.totalorder %s1647_s24, %s1639_s30 }
  0xab   : > { %p1175_p2 = scmp.ne.s32.totalorder %s1647_s24, %s1174_s10  ;;  %p1180_p4 = scmp.lt.s32.totalorder %s1665_s7, %s1174_s10 }
  0xad   : > { %p1181_p5 = por %p1180_p4, %p1179_p3 }
  0xaf   : > { %p1182_p7 = pnand %p1181_p5, %p1175_p2 }
  0xb1   : > { %1185 = shalt.err (!%p1182_p7)  }
  0xb2   : > { %297 = dma.hbm_to_vmem [thread:$0]  %s284_s9, 16, %s1647_s24, [#allocation4 + $0x2] }
  0xb3   : > { %s300_s29 = scalar_lea.hbm %s1825_s2, %s823_s21  ;;  %s1427_s0 = smov [#allocation2 + $0x3]  }
  0xb4   : > { %s310_s11 = sshll.u32 %s1427_s0, 4  ;;  %s1702_s8 = sld [smem:[#allocation7]]  ;;  %s311_s11 = int_to_ptr.vmem [resolvable:$true] %s310_s11 }
  0xb5   : > { %s1186_s20 = scalar_lea.hbm %s300_s29, 16  ;;  %p1189_p11 = scmp.lt.u32.totalorder %s300_s29, %s1825_s2 }
  0xb6   : > { %p1187_p10 = scmp.ne.s32.totalorder %s300_s29, %s1186_s20  ;;  %p1190_p6 = scmp.lt.u32.totalorder %s1656_s18, %s1186_s20 }
  0xb7   : > { %p1192_p0 = scmp.lt.u32.totalorder %s1186_s20, %s300_s29 }
  0xb8   : > { %p1191_p8 = por %p1190_p6, %p1189_p11 }
  0xba   : > { %p1193_p1 = por %p1192_p0, %p1191_p8 }
  0xbc   : > { %p1194_p9 = pnand %p1193_p1, %p1187_p10 }
  0xbe   : > { %1197 = shalt.err (!%p1194_p9)  }
  0xbf   : > { %s1198_s24 = scalar_lea.vmem %s311_s11, 16  ;;  %p1203_p13 = scmp.lt.s32.totalorder %s311_s11, %s1639_s30 }
  0xc0   : > { %p1199_p12 = scmp.ne.s32.totalorder %s311_s11, %s1198_s24  ;;  %p1204_p2 = scmp.lt.s32.totalorder %s1665_s7, %s1198_s24 }
  0xc2   : > { %p1205_p3 = por %p1204_p2, %p1203_p13 }
  0xc4   : > { %p1206_p4 = pnand %p1205_p3, %p1199_p12 }
  0xc6   : > { %1209 = shalt.err (!%p1206_p4)  }
  0xc7   : > { %313 = dma.hbm_to_vmem [thread:$0]  %s300_s29, 16, %s311_s11, [#allocation4 + $0x3] }
  0xc8   : > { %s1428_s9 = smov [#allocation2 + $0x8]   ;;  %s1710_s19 = sld [smem:[#allocation7 + $0x1]] }
  0xc9   : > { %s326_s21 = sshll.u32 %s1428_s9, 4  ;;  %s1429_s3 = smov [#allocation2 + $0x9]   ;;  %s327_s21 = int_to_ptr.vmem [resolvable:$true] %s326_s21 }
  0xca   : > { %s342_s16 = sshll.u32 %s1429_s3, 4  ;;  %s1712_s10 = sld [smem:[#allocation7 + $0x2]]  ;;  %s1715_s16 = int_to_ptr.vmem [resolvable:$true] %s342_s16 }
  0xcb   : > { %s824_s28 = sshll.u32 %s1702_s8, 4 }
  0xcc   : > { %s316_s20 = scalar_lea.hbm %s1825_s2, %s824_s28 }
  0xcd   : > { %s1210_s17 = scalar_lea.hbm %s316_s20, 16  ;;  %p1213_p7 = scmp.lt.u32.totalorder %s316_s20, %s1825_s2 }
  0xce   : > { %p1211_p5 = scmp.ne.s32.totalorder %s316_s20, %s1210_s17  ;;  %p1214_p10 = scmp.lt.u32.totalorder %s1656_s18, %s1210_s17 }
  0xcf   : > { %p1216_p6 = scmp.lt.u32.totalorder %s1210_s17, %s316_s20 }
  0xd0   : > { %p1215_p11 = por %p1214_p10, %p1213_p7 }
  0xd2   : > { %p1217_p8 = por %p1216_p6, %p1215_p11 }
  0xd4   : > { %p1218_p0 = pnand %p1217_p8, %p1211_p5 }
  0xd6   : > { %1221 = shalt.err (!%p1218_p0)  }
  0xd7   : > { %s1222_s22 = scalar_lea.vmem %s327_s21, 16  ;;  %p1227_p9 = scmp.lt.s32.totalorder %s327_s21, %s1639_s30 }
  0xd8   : > { %p1223_p1 = scmp.ne.s32.totalorder %s327_s21, %s1222_s22  ;;  %p1228_p12 = scmp.lt.s32.totalorder %s1665_s7, %s1222_s22 }
  0xda   : > { %p1229_p13 = por %p1228_p12, %p1227_p9 }
  0xdc   : > { %p1230_p2 = pnand %p1229_p13, %p1223_p1 }
  0xde   : > { %1233 = shalt.err (!%p1230_p2)  }
  0xdf   : > { %329 = dma.hbm_to_vmem [thread:$0]  %s316_s20, 16, %s327_s21, [#allocation4 + $0x4] }
  0xe0   : > { %s826_s8 = sshll.u32 %s1710_s19, 4  ;;  %s1430_s24 = smov [#allocation2 + $0xa]  }
  0xe1   : > { %s358_s9 = sshll.u32 %s1430_s24, 4  ;;  %s332_s27 = scalar_lea.hbm %s1825_s2, %s826_s8  ;;  %s1730_s9 = int_to_ptr.vmem [resolvable:$true] %s358_s9 }
  0xe2   : > { %s1234_s0 = scalar_lea.hbm %s332_s27, 16  ;;  %p1237_p4 = scmp.lt.u32.totalorder %s332_s27, %s1825_s2 }
  0xe3   : > { %p1235_p3 = scmp.ne.s32.totalorder %s332_s27, %s1234_s0  ;;  %p1238_p5 = scmp.lt.u32.totalorder %s1656_s18, %s1234_s0 }
  0xe4   : > { %p1240_p10 = scmp.lt.u32.totalorder %s1234_s0, %s332_s27 }
  0xe5   : > { %p1239_p7 = por %p1238_p5, %p1237_p4 }
  0xe7   : > { %p1241_p11 = por %p1240_p10, %p1239_p7 }
  0xe9   : > { %p1242_p6 = pnand %p1241_p11, %p1235_p3 }
  0xeb   : > { %1245 = shalt.err (!%p1242_p6)  }
  0xec   : > { %s1246_s21 = scalar_lea.vmem %s1715_s16, 16  ;;  %p1251_p0 = scmp.lt.s32.totalorder %s1715_s16, %s1639_s30 }
  0xed   : > { %p1247_p8 = scmp.ne.s32.totalorder %s1715_s16, %s1246_s21  ;;  %p1252_p1 = scmp.lt.s32.totalorder %s1665_s7, %s1246_s21 }
  0xef   : > { %p1253_p9 = por %p1252_p1, %p1251_p0 }
  0xf1   : > { %p1254_p12 = pnand %p1253_p9, %p1247_p8 }
  0xf3   : > { %1257 = shalt.err (!%p1254_p12)  }
  0xf4   : > { %345 = dma.hbm_to_vmem [thread:$0]  %s332_s27, 16, %s1715_s16, [#allocation4 + $0x5] }
  0xf5   : > { %s828_s19 = sshll.u32 %s1712_s10, 4  ;;  %s829_s20 = sld [smem:[#allocation7 + $0x3]] }
  0xf6   : > { %s348_s8 = scalar_lea.hbm %s1825_s2, %s828_s19 }
  0xf7   : > { %s1258_s24 = scalar_lea.hbm %s348_s8, 16  ;;  %p1261_p2 = scmp.lt.u32.totalorder %s348_s8, %s1825_s2 }
  0xf8   : > { %p1259_p13 = scmp.ne.s32.totalorder %s348_s8, %s1258_s24  ;;  %p1262_p3 = scmp.lt.u32.totalorder %s1656_s18, %s1258_s24 }
  0xf9   : > { %p1264_p5 = scmp.lt.u32.totalorder %s1258_s24, %s348_s8 }
  0xfa   : > { %p1263_p4 = por %p1262_p3, %p1261_p2 }
  0xfc   : > { %p1265_p7 = por %p1264_p5, %p1263_p4 }
  0xfe   : > { %p1266_p10 = pnand %p1265_p7, %p1259_p13 }
 0x100   : > { %1269 = shalt.err (!%p1266_p10)  }
 0x101   : > { %s1270_s16 = scalar_lea.vmem %s1730_s9, 16  ;;  %p1275_p6 = scmp.lt.s32.totalorder %s1730_s9, %s1639_s30 }
 0x102   : > { %p1271_p11 = scmp.ne.s32.totalorder %s1730_s9, %s1270_s16  ;;  %p1276_p8 = scmp.lt.s32.totalorder %s1665_s7, %s1270_s16 }
 0x104   : > { %p1277_p0 = por %p1276_p8, %p1275_p6 }
 0x106   : > { %p1278_p1 = pnand %p1277_p0, %p1271_p11 }
 0x108   : > { %1281 = shalt.err (!%p1278_p1)  }
 0x109   : > { %361 = dma.hbm_to_vmem [thread:$0]  %s348_s8, 16, %s1730_s9, [#allocation4 + $0x6] }
 0x10a   : > { %s1431_s10 = smov [#allocation2 + $0xb]   ;;  %s830_s0 = sshll.u32 %s829_s20, 4 }
 0x10b   : > { %s374_s27 = sshll.u32 %s1431_s10, 4  ;;  %s364_s21 = scalar_lea.hbm %s1825_s2, %s830_s0  ;;  %s375_s27 = int_to_ptr.vmem [resolvable:$true] %s374_s27 }
 0x10c   : > { %s1282_s19 = scalar_lea.hbm %s364_s21, 16  ;;  %p1285_p12 = scmp.lt.u32.totalorder %s364_s21, %s1825_s2 }
 0x10d   : > { %p1283_p9 = scmp.ne.s32.totalorder %s364_s21, %s1282_s19  ;;  %p1286_p13 = scmp.lt.u32.totalorder %s1656_s18, %s1282_s19 }
 0x10e   : > { %p1288_p3 = scmp.lt.u32.totalorder %s1282_s19, %s364_s21 }
 0x10f   : > { %p1287_p2 = por %p1286_p13, %p1285_p12 }
 0x111   : > { %p1289_p4 = por %p1288_p3, %p1287_p2 }
 0x113   : > { %p1290_p5 = pnand %p1289_p4, %p1283_p9 }
 0x115   : > { %1293 = shalt.err (!%p1290_p5)  }
 0x116   : > { %s1294_s9 = scalar_lea.vmem %s375_s27, 16  ;;  %p1299_p10 = scmp.lt.s32.totalorder %s375_s27, %s1639_s30 }
 0x117   : > { %p1295_p7 = scmp.ne.s32.totalorder %s375_s27, %s1294_s9  ;;  %p1300_p11 = scmp.lt.s32.totalorder %s1665_s7, %s1294_s9 }
 0x119   : > { %p1301_p6 = por %p1300_p11, %p1299_p10 }
 0x11b   : > { %p1302_p8 = pnand %p1301_p6, %p1295_p7 }
 0x11d   : > { %1305 = shalt.err (!%p1302_p8)  }
 0x11e   : > { %377 = dma.hbm_to_vmem [thread:$0]  %s364_s21, 16, %s375_s27, [#allocation4 + $0x7]  ;;  %v1432_v1 = vmov 0.0  }
 0x11f   : > { %386 = vst [vmem:[#allocation2 + $0x4] sm:$0xf] %v1432_v1  ;;  %387 = vst [vmem:[#allocation2 + $0xc] sm:$0xf] %v1432_v1 }
 0x120   : > { %1366 = dma.done.wait [#allocation4], 16 }
 0x121   : > { %1367 = vsyncadd [#allocation4], 4294967280 }
 0x122   : > { %1368 = dma.done.wait [#allocation4 + $0x1], 16 }
 0x123   : > { %1369 = vsyncadd [#allocation4 + $0x1], 4294967280 }
 0x124   : > { %1370 = dma.done.wait [#allocation4 + $0x2], 16 }
 0x125   : > { %1371 = vsyncadd [#allocation4 + $0x2], 4294967280 }
 0x126   : > { %1372 = dma.done.wait [#allocation4 + $0x3], 16 }
 0x127   : > { %1373 = vsyncadd [#allocation4 + $0x3], 4294967280 }
 0x128 PF: > { %p832_p0 = scmp.ne.s32.totalorder %s1408_s13, 1  ;;  %p948_p1 = scmp.eq.s32.totalorder %s1408_s13, 1 }
 0x12a   : > { %1375 = dma.done.wait (%p948_p1), [#allocation4 + $0x4], 16 }
 0x12b   : > { %1377 = vsyncadd (%p948_p1), [#allocation4 + $0x4], 4294967280 }
 0x12c   : > { %1379 = dma.done.wait (%p948_p1), [#allocation4 + $0x5], 16 }
 0x12d   : > { %1381 = vsyncadd (%p948_p1), [#allocation4 + $0x5], 4294967280 }
 0x12e   : > { %1383 = dma.done.wait (%p948_p1), [#allocation4 + $0x6], 16 }
 0x12f   : > { %1385 = vsyncadd (%p948_p1), [#allocation4 + $0x6], 4294967280 }
 0x130   : > { %1387 = dma.done.wait (%p948_p1), [#allocation4 + $0x7], 16 }
 0x131   : > { %1389 = vsyncadd (%p948_p1), [#allocation4 + $0x7], 4294967280  ;;  %v1433_v2 = vmov 0.0   ;;  %vm1434_vm0 = vmmov 0   ;;  %v1018_v3 = vld [vmem:[%s1623_s25] sm:$0xff]   ;;  %v1019_v4 = vld [vmem:[%s1623_s25 + $0x8] sm:$0xff]  }
 0x132   : > { %882 = vmatprep.subr.bf16.mxu0 %v1433_v2  ;;  %898 = vmatprep.mubr.msk.bf16.mxu0 %vm1434_vm0, %v1433_v2  ;;  %v1020_v5 = vld [vmem:[%s1623_s25 + $0x10] sm:$0xff]   ;;  %v1021_v6 = vld [vmem:[%s1623_s25 + $0x18] sm:$0xff]   ;;  %v1022_v7 = vld [vmem:[%s1623_s25 + $0x20] sm:$0xff]   ;;  %s833_s30 = sshll.u32 %s1408_s13, 3  ;;  %v1435_v20 = vmov (!%p832_p0), 0.0   ;;  %vm1436_vm1 = vmmov (!%p832_p0), 0  }
 0x133   : > { %883 = vmatpush3.bf16.msra.mxu0 %v1018_v3  ;;  %v1023_v8 = vld [vmem:[%s1623_s25 + $0x28] sm:$0xff]   ;;  %v1024_v9 = vld [vmem:[%s1623_s25 + $0x30] sm:$0xff]   ;;  %v1025_v10 = vld [vmem:[%s1623_s25 + $0x38] sm:$0xff]   ;;  %s415_s18 = scalar_lea.vmem [#allocation2], %s833_s30 }
 0x134   : > { %884 = vmatprep.subr.bf16.mxu0 %v1433_v2  ;;  %v416_v11 = vld [vmem:[%s415_s18] sm:$0xff]  ;;  %v417_v13 = vld [vmem:[#allocation3] sm:$0xff]  ;;  %v1026_v19 = vld [vmem:[#allocation11] sm:$0xff] (!%p832_p0)  }
 0x135   : > { %v418_v12 = vpack.c.bf16 %v416_v11, %v416_v11  ;;  %v1027_v21 = vld [vmem:[#allocation11 + $0x8] sm:$0xff] (!%p832_p0)   ;;  %v1028_v22 = vld [vmem:[#allocation11 + $0x10] sm:$0xff] (!%p832_p0)   ;;  %v1029_v23 = vld [vmem:[#allocation11 + $0x18] sm:$0xff] (!%p832_p0)  }
 0x136   : > { %v1030_v24 = vld [vmem:[#allocation11 + $0x20] sm:$0xff] (!%p832_p0)   ;;  %v1031_v25 = vld [vmem:[#allocation11 + $0x28] sm:$0xff] (!%p832_p0)   ;;  %v1032_v26 = vld [vmem:[#allocation11 + $0x30] sm:$0xff] (!%p832_p0)  }
 0x137   : > { %885 = vmatpush3.bf16.msra.mxu0 %v1019_v4  ;;  %v1033_v29 = vld [vmem:[#allocation11 + $0x38] sm:$0xff] (!%p832_p0)  }
 0x138   : > { %886 = vmatprep.subr.bf16.mxu0 %v1433_v2 }
 0x13b   : > { %887 = vmatpush3.bf16.msra.mxu0 %v1020_v5 }
 0x13c   : > { %888 = vmatprep.subr.bf16.mxu0 %v1433_v2 }
 0x13f   : > { %889 = vmatpush3.bf16.msra.mxu0 %v1021_v6 }
 0x140   : > { %890 = vmatprep.subr.bf16.mxu0 %v1433_v2 }
 0x143   : > { %891 = vmatpush3.bf16.msra.mxu0 %v1022_v7 }
 0x144   : > { %892 = vmatprep.subr.bf16.mxu0 %v1433_v2 }
 0x147   : > { %893 = vmatpush3.bf16.msra.mxu0 %v1023_v8 }
 0x148   : > { %894 = vmatprep.subr.bf16.mxu0 %v1433_v2 }
 0x14b   : > { %895 = vmatpush3.bf16.msra.mxu0 %v1024_v9 }
 0x14c   : > { %896 = vmatprep.subr.bf16.mxu0 %v1433_v2 }
 0x14f   : > { %897 = vmatpush3.bf16.msra.mxu0 %v1025_v10 }
 0x150   : > { %902 = vmatprep.subr.bf16.mxu0 (!%p832_p0), %v1435_v20 }
 0x152   : > { %899 = vmatmul.mubr.bf16.vlgmr.msra.gmra.mrb[0].mxu0 %v418_v12 }
 0x153   : > { %903 = vmatpush3.bf16.msra.mxu0 (!%p832_p0), %v1026_v19  ;;  %918 = vmatprep.mubr.msk.bf16.mxu0 (!%p832_p0), %vm1436_vm1, %v1435_v20 }
 0x154   : > { %904 = vmatprep.subr.bf16.mxu0 (!%p832_p0), %v1435_v20 }
 0x157   : > { %905 = vmatpush3.bf16.msra.mxu0 (!%p832_p0), %v1027_v21 }
 0x158   : > { %906 = vmatprep.subr.bf16.mxu0 (!%p832_p0), %v1435_v20 }
 0x15b   : > { %907 = vmatpush3.bf16.msra.mxu0 (!%p832_p0), %v1028_v22 }
 0x15c   : > { %908 = vmatprep.subr.bf16.mxu0 (!%p832_p0), %v1435_v20 }
 0x15f   : > { %909 = vmatpush3.bf16.msra.mxu0 (!%p832_p0), %v1029_v23 }
 0x160   : > { %910 = vmatprep.subr.bf16.mxu0 (!%p832_p0), %v1435_v20 }
 0x163   : > { %911 = vmatpush3.bf16.msra.mxu0 (!%p832_p0), %v1030_v24 }
 0x164   : > { %912 = vmatprep.subr.bf16.mxu0 (!%p832_p0), %v1435_v20 }
 0x167   : > { %913 = vmatpush3.bf16.msra.mxu0 (!%p832_p0), %v1031_v25 }
 0x168   : > { %914 = vmatprep.subr.bf16.mxu0 (!%p832_p0), %v1435_v20 }
 0x16b   : > { %915 = vmatpush3.bf16.msra.mxu0 (!%p832_p0), %v1032_v26 }
 0x16c   : > { %916 = vmatprep.subr.bf16.mxu0 (!%p832_p0), %v1435_v20 }
 0x16f   : > { %917 = vmatpush3.bf16.msra.mxu0 (!%p832_p0), %v1033_v29 }
 0x222   : > { %527 = sbr.rel (%p832_p0) target bundleno = 779 (0x30b), region = 84 }
 0x225   : > { %v517_v14 = vpop.f32.mrb[0].mxu0 }
 0x226   : > { %v523_v15 = vadd.f32 %v517_v14, %v417_v13  ;;  %v900_v16 = vpop.f32.mrb[1].mxu0 }
 0x227   : > { %v520_v17 = vpop.f32.mrb[2].mxu0 }
 0x228   : > { %524 = vst [vmem:[#allocation3] sm:$0xff] %v523_v15  ;;  %v901_v18 = vpop.f32.mrb[3].mxu0 }
 0x22f   : > { %v528_v27 = vld [vmem:[#allocation3] sm:$0xff] }
 0x230   : > { %v529_v28 = vmax.f32 %v528_v27, 0.0 }
 0x232   : > { %v530_v30 = vpack.c.bf16 %v529_v28, %v529_v28 }
 0x234   : > { %919 = vmatmul.mubr.bf16.vlgmr.msra.gmra.mrb[0].mxu0 %v530_v30 }
 0x307   : > { %v629_v31 = vpop.f32.mrb[0].mxu0 }
 0x308   : > { %635 = vst [vmem:[#allocation13] sm:$0xff] %v629_v31  ;;  %v920_v32 = vpop.f32.mrb[1].mxu0 }
 0x309   : > { %v632_v33 = vpop.f32.mrb[2].mxu0 }
 0x30a   : > { %v921_v34 = vpop.f32.mrb[3].mxu0 }
 0x30b PF: > { %s1846_s13 = sadd.s32 4294967295, %s1416_s15   ;;  %s1437_s7 = smov [#allocation13]  }
 0x30c   : > { %p1780_p9 = scmp.eq.s32.totalorder %s1846_s13, 1  ;;  %s645_s20 = sshll.u32 %s1437_s7, 4  ;;  %s646_s20 = int_to_ptr.vmem [resolvable:$true] %s645_s20 }
 0x30d   : > { %s1306_s8 = scalar_lea.vmem %s646_s20, 128  ;;  %p1313_p3 = scmp.lt.s32.totalorder %s646_s20, %s646_s20 }
 0x30e   : > { %p1307_p12 = scmp.ne.s32.totalorder %s646_s20, %s1306_s8  ;;  %p1314_p4 = scmp.lt.s32.totalorder %s1306_s8, %s1306_s8 }
 0x310   : > { %p1308_p13 = pnand %p1307_p12, %p1780_p9  ;;  %p1315_p5 = por %p1314_p4, %p1313_p3 }
 0x312   : > { %p1309_p2 = pneg %p1308_p13 }
 0x314   : > { %p1316_p7 = pnand %p1315_p5, %p1309_p2 }
 0x316   : > { %1319 = shalt.err (!%p1316_p7)
}
 0x317   : > { %s1320_s28 = scalar_lea.hbm %s1829_s6, 128 }
 0x318   : > { %p1321_p10 = scmp.ne.s32.totalorder %s1829_s6, %s1320_s28  ;;  %p1326_p8 = scmp.lt.u32.totalorder %s1320_s28, %s1829_s6 }
 0x31a   : > { %p1322_p11 = pnand %p1321_p10, %p1780_p9 }
 0x31c   : > { %p1323_p6 = pneg %p1322_p11 }
 0x31e   : > { %p1328_p0 = pnand %p1326_p8, %p1323_p6 }
 0x320   : > { %1331 = shalt.err (!%p1328_p0)
}
 0x321   : > { %934 = dma.vmem_to_hbm [thread:$0]  (%p1780_p9), %s646_s20, 128, %s1829_s6, [#allocation10]  }
 0x322   : > { %1391 = dma.done.wait (%p1780_p9), [#allocation10], 128  }
 0x323   : > { %1393 = vsyncadd (%p1780_p9), [#allocation10], 4294967168 }
 0x324 PF: > { %s29_s15 = sadd.s32 1, %s1416_s15   ;;  %s1848_s0 = smov %s1400_s1 }
 0x325   : > { %p26_p1 = scmp.ge.s32.totalorder %s29_s15, 4   ;;  %s1849_s1 = smov %s1404_s12 }
 0x326   : > { %s1850_s12 = smov %s1576_s26  ;;  %s1851_s13 = smov %s1412_s14 }
 0x327   : > { %s1852_s14 = smov %s1854_s23  ;;  %28 = sbr.rel (!%p26_p1) target bundleno = 28 (0x1c), region = 156 }
 0x32e   :  { %658 = vsyncpa [#allocation9], 1 }
 0x32f   :  { %660 = vsyncpa [#allocation9 + $0x1], 1 }
 0x330   :  { %661 = vsyncpa [#allocation12], 1 }
 0x331   :  { %662 = vsyncpa [#allocation10], 1 }
 0x332   :  { %664 = vsyncpa [#allocation10 + $0x1], 1 }
 0x333   :  { %665 = vsyncmov [#allocation4] }
 0x336   :  { %s666_s21 = vpop.sfrf %665 }
 0x337   :  { %p855_p9 = scmp.ne.s32.totalorder %s666_s21, 0 }
 0x339   :  { %670 = shalt.err (%p855_p9)  }
 0x33a   :  { %672 = vsyncmov [#allocation4 + $0x1] }
 0x33d   :  { %s673_s19 = vpop.sfrf %672 }
 0x33e   :  { %p856_p12 = scmp.ne.s32.totalorder %s673_s19, 0 }
 0x340   :  { %677 = shalt.err (%p856_p12)  }
 0x341   :  { %679 = vsyncmov [#allocation4 + $0x2] }
 0x344   :  { %s680_s26 = vpop.sfrf %679 }
 0x345   :  { %p857_p13 = scmp.ne.s32.totalorder %s680_s26, 0 }
 0x347   :  { %684 = shalt.err (%p857_p13)  }
 0x348   :  { %686 = vsyncmov [#allocation4 + $0x3] }
 0x34b   :  { %s687_s15 = vpop.sfrf %686 }
 0x34c   :  { %p858_p2 = scmp.ne.s32.totalorder %s687_s15, 0 }
 0x34e   :  { %691 = shalt.err (%p858_p2)  }
 0x34f   :  { %693 = vsyncmov [#allocation4 + $0x4] }
 0x352   :  { %s694_s2 = vpop.sfrf %693 }
 0x353   :  { %p859_p3 = scmp.ne.s32.totalorder %s694_s2, 0 }
 0x355   :  { %698 = shalt.err (%p859_p3)  }
 0x356   :  { %700 = vsyncmov [#allocation4 + $0x5] }
 0x359   :  { %s701_s4 = vpop.sfrf %700 }
 0x35a   :  { %p860_p4 = scmp.ne.s32.totalorder %s701_s4, 0 }
 0x35c   :  { %705 = shalt.err (%p860_p4)  }
 0x35d   :  { %707 = vsyncmov [#allocation4 + $0x6] }
 0x360   :  { %s708_s5 = vpop.sfrf %707 }
 0x361   :  { %p861_p5 = scmp.ne.s32.totalorder %s708_s5, 0 }
 0x363   :  { %712 = shalt.err (%p861_p5)  }
 0x364   :  { %714 = vsyncmov [#allocation4 + $0x7] }
 0x367   :  { %s715_s6 = vpop.sfrf %714 }
 0x368   :  { %p862_p7 = scmp.ne.s32.totalorder %s715_s6, 0 }
 0x36a   :  { %719 = shalt.err (%p862_p7)  }

</bundles_post_ra>
